<compile_context>
chip_gen: v5e
topology: v5e:2x2
jax: 0.10.0
libtpu: 0.0.40
codegen_flags: <defaults>
</compile_context>

<pallas_src>
import functools

import jax
import jax.numpy as jnp
from jax.experimental import pallas as pl
from jax.experimental.pallas import tpu as pltpu


def _conv1d_relu_kernel(x_ref, w_ref, b_ref, o_ref, xcols_ref):
    """One batch element per grid step.

    x_ref:     (1, C_in, L)     input (NCL layout), compute dtype (bf16)
    w_ref:     (C_out, K*C_in)  weights, column ordering = k*C_in + ci
    b_ref:     (C_out, 1)       bias, float32
    o_ref:     (1, C_out, L)    output (NCL layout), float32
    xcols_ref: (K*C_in, L)      VMEM scratch holding the im2col slab
    """
    C_in = x_ref.shape[1]
    L = x_ref.shape[2]
    KC = w_ref.shape[1]
    K = KC // C_in
    pad = K // 2

    # Build the im2col slab: row (k*C_in + ci), column l holds
    # x[ci, l + k - pad], and exact zeros where that index falls outside
    # [0, L) ("same" padding handled here, not in the wrapper).
    xcols_ref[...] = jnp.zeros_like(xcols_ref)
    for k in range(K):                       # static unroll over the K taps
        off = k - pad                        # -pad .. +pad
        width = L - abs(off)
        if width <= 0:
            continue
        src_lo = max(0, off)                 # source column range in x
        dst_lo = max(0, -off)                # destination column range in slab
        xcols_ref[pl.ds(k * C_in, C_in), pl.ds(dst_lo, width)] = (
            x_ref[0, :, pl.ds(src_lo, width)])

    # Single MXU contraction: (C_out, K*C_in) @ (K*C_in, L) -> (C_out, L),
    # accumulated in float32.
    acc = jnp.dot(w_ref[...], xcols_ref[...],
                  preferred_element_type=jnp.float32)
    acc = acc + b_ref[...]                   # (C_out, 1) broadcast over lanes
    o_ref[0] = jnp.maximum(acc, 0.0).astype(o_ref.dtype)   # ReLU


@functools.partial(jax.jit, static_argnames=("kernel_size", "compute_dtype"))
def conv1d_relu(x_ncl, weight, bias, *, kernel_size, compute_dtype=jnp.bfloat16):
    """Pallas implementation of the `conv1d` module forward pass.

    Args:
      x_ncl:  (B, C_in, L)  float32 -- PyTorch NCL layout.
      weight: (C_out, C_in, K) float32 -- nn.Conv1d weight layout.
      bias:   (C_out,) float32.
      kernel_size: K (odd).
      compute_dtype: dtype for x / weights fed to the MXU (accumulation f32).

    Returns:
      (B, C_out, L) float32, == ReLU(Conv1d(x)).
    """
    B, C_in, L = x_ncl.shape
    C_out = weight.shape[0]
    K = kernel_size
    assert K & 1 == 1, "kernel_size must be odd"
    assert weight.shape == (C_out, C_in, K)

    x = x_ncl.astype(compute_dtype)                                  # (B, C_in, L)
    # (C_out, C_in, K) -> (C_out, K, C_in) -> (C_out, K*C_in); col = k*C_in + ci,
    # matching the im2col row ordering built inside the kernel.
    w2d = jnp.transpose(weight, (0, 2, 1)).reshape(C_out, K * C_in)
    w2d = w2d.astype(compute_dtype)
    b2d = bias.reshape(C_out, 1).astype(jnp.float32)

    out = pl.pallas_call(
        _conv1d_relu_kernel,
        out_shape=jax.ShapeDtypeStruct((B, C_out, L), jnp.float32),
        grid_spec=pltpu.PrefetchScalarGridSpec(
            num_scalar_prefetch=0,
            grid=(B,),
            in_specs=[
                pl.BlockSpec((1, C_in, L), lambda b: (b, 0, 0)),
                pl.BlockSpec((C_out, K * C_in), lambda b: (0, 0)),
                pl.BlockSpec((C_out, 1), lambda b: (0, 0)),
            ],
            out_specs=pl.BlockSpec((1, C_out, L), lambda b: (b, 0, 0)),
            scratch_shapes=[pltpu.VMEM((K * C_in, L), compute_dtype)],
        ),
        compiler_params=pltpu.CompilerParams(
            dimension_semantics=("parallel",),
            vmem_limit_bytes=32 * 1024 * 1024,
        ),
    )(x, w2d, b2d)
    return out


def _reference_conv1d_relu(x_ncl, weight, bias, compute_dtype=jnp.bfloat16):
    """Pure-JAX reference (lax conv) with the same operand precision."""
    out = jax.lax.conv_general_dilated(
        x_ncl.astype(compute_dtype), weight.astype(compute_dtype),
        window_strides=(1,),
        padding="SAME",
        dimension_numbers=("NCH", "OIH", "NCH"),
        preferred_element_type=jnp.float32,
    )
    out = out + bias[None, :, None].astype(jnp.float32)
    return jnp.maximum(out, 0.0)


if __name__ == "__main__":
    # Module config (synthetic, deterministic init -- no checkpoint loading).
    batch_size = 2
    in_channels = 4
    out_channels = 8
    kernel_size = 5        # must be odd (asserted by the PyTorch module)
    length = 16

    key = jax.random.PRNGKey(0)
    kx, kw, kb = jax.random.split(key, 3)

    x = jax.random.normal(kx, (batch_size, in_channels, length), dtype=jnp.float32)
    # nn.Conv1d weight shape: (out_channels, in_channels, kernel_size)
    weight = jax.random.normal(
        kw, (out_channels, in_channels, kernel_size), dtype=jnp.float32) * 0.1
    bias = jax.random.normal(kb, (out_channels,), dtype=jnp.float32) * 0.1

    out = conv1d_relu(x, weight, bias, kernel_size=kernel_size)
    out = jax.block_until_ready(out)

    ref = jax.block_until_ready(_reference_conv1d_relu(x, weight, bias))
    assert out.shape == (batch_size, out_channels, length)
    assert jnp.allclose(out, ref, atol=1e-4, rtol=1e-4), "mismatch vs reference"

    print("KERNEL_OK")
</pallas_src>

<mosaic_0001>
module attributes {stable_mosaic.version = 11 : i64} {
  func.func @_conv1d_relu_kernel(%arg0: i32, %arg1: memref<1x4x16xbf16, #tpu.memory_space<vmem>>, %arg2: memref<8x20xbf16, #tpu.memory_space<vmem>>, %arg3: memref<8x1xf32, #tpu.memory_space<vmem>>, %arg4: memref<1x8x16xf32, #tpu.memory_space<vmem>>, %arg5: memref<20x16xbf16, #tpu.memory_space<vmem>>) attributes {dimension_semantics = [#tpu.dimension_semantics<parallel>], iteration_bounds = array<i64: 2>, scalar_prefetch = 0 : i64, scratch_operands = 1 : i64, tpu.core_type = #tpu.core_type<tc>, window_params = [{transform_indices = @transform_0, window_bounds = array<i64: 1, 4, 16>}, {pipeline_mode = #tpu.pipeline_mode<synchronous>, transform_indices = @transform_1, window_bounds = array<i64: 8, 20>}, {pipeline_mode = #tpu.pipeline_mode<synchronous>, transform_indices = @transform_2, window_bounds = array<i64: 8, 1>}, {transform_indices = @transform_3, window_bounds = array<i64: 1, 8, 16>}]} {
    %cst = arith.constant 0.000000e+00 : bf16
    %0 = vector.broadcast %cst : bf16 to vector<20x16xbf16>
    %c0 = arith.constant 0 : index
    %c0_0 = arith.constant 0 : index
    %1 = vector.load %arg5[%c0, %c0_0] : memref<20x16xbf16, #tpu.memory_space<vmem>>, vector<20x16xbf16>
    tpu.vector_store %arg5[%c0, %c0_0], %0 {strides = array<i32>} : memref<20x16xbf16, #tpu.memory_space<vmem>>, vector<20x16xbf16>,
    %c0_1 = arith.constant 0 : index
    %c0_2 = arith.constant 0 : index
    %c0_3 = arith.constant 0 : index
    %2 = vector.load %arg1[%c0_1, %c0_2, %c0_3] : memref<1x4x16xbf16, #tpu.memory_space<vmem>>, vector<1x4x14xbf16>
    %3 = vector.shape_cast %2 : vector<1x4x14xbf16> to vector<4x14xbf16>
    %c0_4 = arith.constant 0 : index
    %c2 = arith.constant 2 : index
    %4 = vector.load %arg5[%c0_4, %c2] : memref<20x16xbf16, #tpu.memory_space<vmem>>, vector<4x14xbf16>
    tpu.vector_store %arg5[%c0_4, %c2], %3 {strides = array<i32>} : memref<20x16xbf16, #tpu.memory_space<vmem>>, vector<4x14xbf16>,
    %c0_5 = arith.constant 0 : index
    %c0_6 = arith.constant 0 : index
    %c0_7 = arith.constant 0 : index
    %5 = vector.load %arg1[%c0_5, %c0_6, %c0_7] : memref<1x4x16xbf16, #tpu.memory_space<vmem>>, vector<1x4x15xbf16>
    %6 = vector.shape_cast %5 : vector<1x4x15xbf16> to vector<4x15xbf16>
    %c4 = arith.constant 4 : index
    %c1 = arith.constant 1 : index
    %7 = vector.load %arg5[%c4, %c1] : memref<20x16xbf16, #tpu.memory_space<vmem>>, vector<4x15xbf16>
    tpu.vector_store %arg5[%c4, %c1], %6 {strides = array<i32>} : memref<20x16xbf16, #tpu.memory_space<vmem>>, vector<4x15xbf16>,
    %c0_8 = arith.constant 0 : index
    %c0_9 = arith.constant 0 : index
    %c0_10 = arith.constant 0 : index
    %8 = vector.load %arg1[%c0_8, %c0_9, %c0_10] : memref<1x4x16xbf16, #tpu.memory_space<vmem>>, vector<1x4x16xbf16>
    %9 = vector.shape_cast %8 : vector<1x4x16xbf16> to vector<4x16xbf16>
    %c8 = arith.constant 8 : index
    %c0_11 = arith.constant 0 : index
    %10 = vector.load %arg5[%c8, %c0_11] : memref<20x16xbf16, #tpu.memory_space<vmem>>, vector<4x16xbf16>
    tpu.vector_store %arg5[%c8, %c0_11], %9 {strides = array<i32>} : memref<20x16xbf16, #tpu.memory_space<vmem>>, vector<4x16xbf16>,
    %c0_12 = arith.constant 0 : index
    %c0_13 = arith.constant 0 : index
    %c1_14 = arith.constant 1 : index
    %11 = vector.load %arg1[%c0_12, %c0_13, %c1_14] : memref<1x4x16xbf16, #tpu.memory_space<vmem>>, vector<1x4x15xbf16>
    %12 = vector.shape_cast %11 : vector<1x4x15xbf16> to vector<4x15xbf16>
    %c12 = arith.constant 12 : index
    %c0_15 = arith.constant 0 : index
    %13 = vector.load %arg5[%c12, %c0_15] : memref<20x16xbf16, #tpu.memory_space<vmem>>, vector<4x15xbf16>
    tpu.vector_store %arg5[%c12, %c0_15], %12 {strides = array<i32>} : memref<20x16xbf16, #tpu.memory_space<vmem>>, vector<4x15xbf16>,
    %c0_16 = arith.constant 0 : index
    %c0_17 = arith.constant 0 : index
    %c2_18 = arith.constant 2 : index
    %14 = vector.load %arg1[%c0_16, %c0_17, %c2_18] : memref<1x4x16xbf16, #tpu.memory_space<vmem>>, vector<1x4x14xbf16>
    %15 = vector.shape_cast %14 : vector<1x4x14xbf16> to vector<4x14xbf16>
    %c16 = arith.constant 16 : index
    %c0_19 = arith.constant 0 : index
    %16 = vector.load %arg5[%c16, %c0_19] : memref<20x16xbf16, #tpu.memory_space<vmem>>, vector<4x14xbf16>
    tpu.vector_store %arg5[%c16, %c0_19], %15 {strides = array<i32>} : memref<20x16xbf16, #tpu.memory_space<vmem>>, vector<4x14xbf16>,
    %c0_20 = arith.constant 0 : index
    %c0_21 = arith.constant 0 : index
    %17 = vector.load %arg2[%c0_20, %c0_21] : memref<8x20xbf16, #tpu.memory_space<vmem>>, vector<8x20xbf16>
    %c0_22 = arith.constant 0 : index
    %c0_23 = arith.constant 0 : index
    %18 = vector.load %arg5[%c0_22, %c0_23] : memref<20x16xbf16, #tpu.memory_space<vmem>>, vector<20x16xbf16>
    %cst_24 = arith.constant dense<0.000000e+00> : vector<8x16xf32>
    %19 = tpu.matmul %17, %18, %cst_24 {dimension_numbers = #tpu.dot_dimension_numbers<[1], [0], [0], [1], [0, 0, 1, 1], [], []>} : vector<8x20xbf16>, vector<20x16xbf16>, vector<8x16xf32> -> vector<8x16xf32>
    %c0_25 = arith.constant 0 : index
    %c0_26 = arith.constant 0 : index
    %20 = vector.load %arg3[%c0_25, %c0_26] : memref<8x1xf32, #tpu.memory_space<vmem>>, vector<8x1xf32>
    %21 = vector.broadcast %20 : vector<8x1xf32> to vector<8x16xf32>
    %22 = arith.addf %19, %21 : vector<8x16xf32>
    %cst_27 = arith.constant 0.000000e+00 : f32
    %23 = vector.broadcast %cst_27 : f32 to vector<8x16xf32>
    %24 = arith.maximumf %22, %23 : vector<8x16xf32>
    %c0_28 = arith.constant 0 : index
    %c0_29 = arith.constant 0 : index
    %c0_30 = arith.constant 0 : index
    %25 = vector.load %arg4[%c0_28, %c0_29, %c0_30] : memref<1x8x16xf32, #tpu.memory_space<vmem>>, vector<1x8x16xf32>
    %26 = vector.shape_cast %25 : vector<1x8x16xf32> to vector<8x16xf32>
    %27 = vector.shape_cast %24 : vector<8x16xf32> to vector<1x8x16xf32>
    tpu.vector_store %arg4[%c0_28, %c0_29, %c0_30], %27 {strides = array<i32>} : memref<1x8x16xf32, #tpu.memory_space<vmem>>, vector<1x8x16xf32>,
    return
  }
  func.func @transform_0(%arg0: i32) -> (i32, i32, i32) {
    %c0_i32 = arith.constant 0 : i32
    %c0_i32_0 = arith.constant 0 : i32
    %c0_i32_1 = arith.constant 0 : i32
    return %arg0, %c0_i32, %c0_i32_0 : i32, i32, i32
  }
  func.func @transform_1(%arg0: i32) -> (i32, i32) {
    %c0_i32 = arith.constant 0 : i32
    %c0_i32_0 = arith.constant 0 : i32
    %c0_i32_1 = arith.constant 0 : i32
    return %c0_i32, %c0_i32_0 : i32, i32
  }
  func.func @transform_2(%arg0: i32) -> (i32, i32) {
    %c0_i32 = arith.constant 0 : i32
    %c0_i32_0 = arith.constant 0 : i32
    %c0_i32_1 = arith.constant 0 : i32
    return %c0_i32, %c0_i32_0 : i32, i32
  }
  func.func @transform_3(%arg0: i32) -> (i32, i32, i32) {
    %c0_i32 = arith.constant 0 : i32
    %c0_i32_0 = arith.constant 0 : i32
    %c0_i32_1 = arith.constant 0 : i32
    return %arg0, %c0_i32, %c0_i32_0 : i32, i32, i32
  }
}

</mosaic_0001>

<bundles_post_ra>
// kernel: conv1d_relu.1
= control target key start
LH: loop header
LB: loop body
LE: loop exit
PB: predicated region body
PF: predicated region fallthrough
CT: control target
= control target key end

     0   :  { %8 = vsyncpa [#allocation4], 0  ;;  %s576_s0 = inlined_call_operand.vmem [shape: bf16[2,4,16], index: 0, kind: input, shape index: {}]   ;;  %s577_s1 = inlined_call_operand.vmem [shape: bf16[8,20], index: 1, kind: input, shape index: {}]   ;;  %s578_s2 = inlined_call_operand.vmem [shape: f32[8,1], index: 2, kind: input, shape index: {}]   ;;  %s579_s3 = inlined_call_operand.hbm [shape: f32[2,8,16], index: 3, kind: output, shape index: {}]  }
   0x1   :  { %10 = vsyncpa [#allocation4 + $0x1], 0  ;;  %s485_s12 = smov 0   ;;  %s487_s13 = smov 0  }
   0x2   :  { %s489_s14 = smov 0   ;;  %s491_s15 = smov 0  }
   0x3 LB: > { %s506_s16 = sadd.s32 4294967295, %s458_s15   ;;  %s334_s17 = sadd.s32 4294967294, %s458_s15   ;;  %s458_s15 = sphi %s491_s15, %s585_s15   ;;  %s454_s14 = sphi %s489_s14, %s584_s14   ;;  %s450_s13 = sphi %s487_s13, %s583_s13   ;;  %s446_s12 = sphi %s485_s12, %s582_s12  }
   0x4   : > { %s510_s18 = sadd.s32 1, %s458_s15   ;;  %s91_s19 = sadd.s32 1, %s454_s14 }
   0x5   : > { %s88_s20 = ssub.s32 %s458_s15, %s510_s18  ;;  %p101_p0 = scmp.ne.s32.totalorder %s454_s14, %s450_s13 }
   0x6   : > { %p89_p1 = scmp.eq.s32.totalorder %s88_s20, 0  ;;  %p102_p2 = scmp.eq.s32.totalorder %s506_s16, 1 }
   0x7   : > { %p107_p3 = scmp.ne.s32.totalorder %s450_s13, %s446_s12  ;;  %p108_p4 = scmp.eq.s32.totalorder %s334_s17, 1 }
   0x8   : > { %s521_s21 = scalar_select %p89_p1, %s454_s14, %s91_s19  }
   0x9   : > { %p523_p5 = por %p102_p2, %p101_p0  ;;  %p527_p6 = por %p108_p4, %p107_p3 }
   0xa   : > { %p337_p7 = scmp.ge.s32.totalorder %s458_s15, 1  ;;  %p139_p8 = scmp.lt.s32.totalorder %s458_s15, 3 }
   0xc   : > { %p140_p9 = pnand %p337_p7, %p139_p8 }
   0xd   : > { %p162_p10 = scmp.lt.s32.totalorder (!%p140_p9), %s506_s16, 1  ;;  %s461_s29 = smov (!%p140_p9), 1  }
   0xe   : > { %143 = sbr.rel (%p140_p9) target bundleno = 325 (0x145), region = 32  ;;  %s462_s30 = smov (!%p140_p9), 127  }
   0xf   : > { %s463_s4 = smov (!%p140_p9), 126   ;;  %s464_s5 = smov (!%p140_p9), 2  }
  0x10   : > { %s159_s10 = sand.u32 (!%p140_p9), 1, %s450_s13   ;;  %s346_s17 = sshll.u32 (!%p140_p9), %s506_s16, 3 }
  0x11   : > { %s338_s11 = sshll.u32 (!%p140_p9), %s159_s10, 3 }
  0x13   : > { %s163_s24 = scalar_select %p162_p10, %s506_s16, 1  ;;  %vm167_vm0 = vcmask 125952   ;;  %v460_v3 = vmov 0   ;;  %vm170_vm1 = vcmask 123904   ;;  %vm191_vm2 = vcmask 125962   ;;  %v220_v11 = vld [vmem:[%s578_s2] sm:$0xff] }
  0x14   : > { %168 = vst.msk [vmem:[#allocation2] sm:$0xf] %vm167_vm0, %v460_v3  ;;  %394 = vset.pattern.permute.xlu2 %v460_v3  ;;  %395 = vset.pattern.permute.xlu0 %v460_v3  ;;  %vm204_vm3 = vcmask 117762   ;;  %vm214_vm4 = vcmask 107520   ;;  %vm180_vm5 = vcmask 123920   ;;  %vm239_vm6 = vcmask 1041408  }
  0x15   : > { %s339_s25 = sshll.u32 %s163_s24, 1  ;;  %169 = vst.msk [vmem:[#allocation2 + $0x4] sm:$0xf] %vm167_vm0, %v460_v3  ;;  %223 = vperm.xlu2 %394, %v220_v11   ;;  %v216_v20 = vld [vmem:[%s577_s1] sm:$0xf]  ;;  %vm235_vm7 = vcmask 162816   ;;  %s270_s24 = scalar_lea.hbm %s579_s3, %s346_s17 }
  0x16   : > { %s165_s28 = scalar_lea.vmem %s576_s0, %s339_s25  ;;  %171 = vst.msk [vmem:[#allocation2 + $0x8] sm:$0x3] %vm170_vm1, %v460_v3  ;;  %s161_s25 = scalar_lea.vmem [#allocation3], %s338_s11  ;;  %vm257_vm8 = vcmask 130048  }
  0x17   : > { %v172_v0 = vld [vmem:[%s165_s28] sm:$0x3]  ;;  %s272_s26 = sshll.u32 %s161_s25, 4  ;;  %s274_s27 = sshll.u32 %s270_s24, 4  ;;  %s273_s26 = int_to_ptr.vmem [resolvable:$true] %s272_s26  ;;  %s275_s27 = int_to_ptr.hbm [resolvable:$true] %s274_s27 }
  0x18   : > { %174 = vst [vmem:[#allocation1] ss:$2 sm:$0xff] %v172_v0  ;;  %v182_v1 = vld [vmem:[%s165_s28] sm:$0x3] }
  0x19   : > { %v195_v4 = vld [vmem:[%s165_s28] sm:$0x3] }
  0x1a   : > { %v206_v6 = vld [vmem:[%s165_s28] sm:$0x3] }
  0x1b   : > { %v193_v9 = vld [vmem:[%s165_s28] sm:$0x3]  ;;  %s260_s28 = scalar_lea.sflag [#allocation4], %s159_s10 }
  0x1c   : > { %194 = vst.msk [vmem:[#allocation2 + $0x4] sm:$0x3] %vm170_vm1, %v193_v9 }
  0x1f   : > { %v175_v2 = vld.sshfl [vmem:[#allocation1] sm:$0xff pattern:$0x75643120] }
  0x20   : > { %185 = vst [vmem:[#allocation1 + $0x1] ss:$2 sm:$0xff] %v182_v1 }
  0x27   : > { %v186_v5 = vld.sshfl [vmem:[#allocation1] sm:$0xff pattern:$0x75643120] }
  0x28   : > { %188 = vrot.lane.b32.xlu1 %v186_v5, %s461_s29  ;;  %198 = vst [vmem:[#allocation1 + $0x1] ss:$2 sm:$0xff] %v195_v4  ;;  %s410_s29 = sshra.s32 %s275_s27, 4  ;;  %s411_s29 = int_to_ptr.hbm [resolvable:$true] %s410_s29 }
  0x29   : > { %s412_s16 = scalar_lea.hbm %s411_s29, 8  ;;  %p417_p0 = scmp.lt.s32.totalorder %s411_s29, %s579_s3 }
  0x2a   : > { %p413_p11 = scmp.ne.s32.totalorder %s411_s29, %s412_s16 }
  0x2c   : > { %p414_p12 = pnand %p413_p11, %p523_p5 }
  0x2e   : > { %p415_p13 = pneg %p414_p12 }
  0x2f   : > { %v199_v7 = vld.sshfl [vmem:[#allocation1] sm:$0xff pattern:$0x75643120] }
  0x30   : > { %208 = vst [vmem:[#allocation1] ss:$2 sm:$0xff] %v206_v6  ;;  %201 = vrot.lane.b32.xlu1 %v199_v7, %s462_s30 }
  0x37   : > { %v209_v8 = vld.sshfl [vmem:[#allocation1] sm:$0xff pattern:$0x75643120] }
  0x38   : > { %211 = vrot.lane.b32.xlu0 %v209_v8, %s463_s4 }
  0x40   : > { %177 = vrot.lane.b32.xlu0 %v175_v2, %s464_s5  ;;  %s416_s5 = scalar_lea.hbm %s579_s3, 16 }
  0x41   : > { %p418_p1 = scmp.lt.s32.totalorder %s416_s5, %s412_s16 }
  0x43   : > { %p419_p2 = por %p418_p1, %p417_p0 }
  0x45   : > { %p420_p3 = pnand %p419_p2, %p415_p13 }
  0x6f   : > { %v224_v21 = vpop.permute.xlu2 %223 }
  0x9a   : > { %v189_v10 = vpop.permute.xlu1 %188 }
  0x9b   : > { %192 = vst.msk [vmem:[#allocation2] sm:$0xc] %vm191_vm2, %v189_v10 }
  0xa2   : > { %v202_v12 = vpop.permute.xlu1 %201 }
  0xa3   : > { %205 = vst.msk [vmem:[#allocation2 + $0x4] sm:$0xc] %vm204_vm3, %v202_v12 }
  0xaa   : > { %v212_v13 = vpop.permute.xlu0 %211 }
  0xab   : > { %215 = vst.msk [vmem:[#allocation2 + $0x8] sm:$0x3] %vm214_vm4, %v212_v13 }
  0xb2   : > { %v178_v14 = vpop.permute.xlu0 %177  ;;  %v219_v15 = vld [vmem:[#allocation2 + $0x8] sm:$0x3] }
  0xb3   : > { %181 = vst.msk [vmem:[#allocation2] sm:$0x3] %vm180_vm5, %v178_v14  ;;  %v231_v16 = vunpack.c.l.b16 %v219_v15 }
  0xb5   : > { %v233_v17 = vpack.c.b16 %v231_v16, %v231_v16 }
  0xb7   : > { %v241_v18 = vsel %vm239_vm6, %v233_v17, 0 }
  0xb8   : > { %249 = vmatpush.bf16.msra.mxu0 %v241_v18 }
  0xba   : > { %v349_v19 = vld [vmem:[#allocation2] sm:$0xff] }
  0xbc   : > { %250 = vmatpush.bf16.msra.mxu0 %v349_v19 }
  0xbf   : > { %344 = vmatmul.msk.bf16.vlgmr.msra.gmra.mxu0 %vm235_vm7, %v216_v20 }
 0x13c   : > { %v252_v22 = vpop.f32.mrf.mxu0 }
 0x13d   : > { %v253_v23 = vadd.f32 %v252_v22, %v224_v21 }
 0x13f   : > { %v256_v24 = vmax.f32 %v253_v23, 0.0 }
 0x141   : > { %258 = vst.msk [vmem:[%s161_s25] sm:$0xff] %vm257_vm8, %v256_v24 }
 0x142   : > { %423 = shalt.err (!%p420_p3)
}
 0x143   : > { %350 = dma.vmem_to_hbm [thread:$0]  (%p523_p5), %s273_s26, 128, %s275_s27, %s260_s28  }
 0x144   : > { %v254_v25 = vpop.f32.mrf.mxu0 }
 0x145 PF: > { %p356_p4 = scmp.ge.s32.totalorder %s458_s15, 2  ;;  %s286_s8 = sand.u32 1, %s446_s12  }
 0x146   : > { %s287_s9 = scalar_lea.sflag [#allocation4], %s286_s8 }
 0x147   : > { %p353_p7 = pnand %p356_p4, %p527_p6 }
 0x149   : > { %p354_p8 = pneg %p353_p7 }
 0x14b   : > { %441 = dma.done.wait (%p354_p8), %s287_s9, 128  }
 0x14c   : > { %443 = vsyncadd (%p354_p8), %s287_s9, 4294967168  ;;  %p13_p9 = scmp.ge.s32.totalorder %s510_s18, 4   ;;  %s582_s12 = smov %s450_s13 }
 0x14d   : > { %s583_s13 = smov %s454_s14  ;;  %s584_s14 = smov %s521_s21 }
 0x14e   : > { %s585_s15 = smov %s510_s18  ;;  %15 = sbr.rel (!%p13_p9) target bundleno = 3 (0x3), region = 69 }
 0x153   :  { %293 = vsyncpa [#allocation4], 1 }
 0x154   :  { %295 = vsyncpa [#allocation4 + $0x1], 1 }

</bundles_post_ra>
